<compile_context>
chip_gen: v5e
topology: v5e:2x2
jax: 0.10.0
libtpu: 0.0.40
codegen_flags: <defaults>
</compile_context>

<pallas_src>
import jax
import jax.numpy as jnp
from jax.experimental import pallas as pl
from jax.experimental.pallas import tpu as pltpu

_LANE = 128      # lane width (last dim)
_SUBLANE = 8     # sublane width (second-last dim)


def _round_up(n: int, m: int) -> int:
    return ((n + m - 1) // m) * m


def _cdiv(a: int, b: int) -> int:
    return (a + b - 1) // b


def _mlp_kernel(x_ref, w1_ref, b1_ref, w2_ref, b2_ref, o_ref):
    # In-kernel f32 -> bf16 cast (free VALU slot; kernel is DMA-bound), so the
    # wrapper never writes a padded/cast copy of x to HBM.
    x = x_ref[...].astype(w1_ref.dtype)
    # fc1 on the MXU: [TB, In] @ [In, H_p], f32 accumulation.
    h = jnp.dot(x, w1_ref[...], preferred_element_type=jnp.float32)
    # Bias add + ReLU in f32 on the VPU (v5e has no bf16 VALU path).
    h = jnp.maximum(h + b1_ref[...], 0.0)
    # fc2 on the MXU: [TB, H_p] @ [H_p, Out_p].
    out = jnp.dot(h.astype(w2_ref.dtype), w2_ref[...],
                  preferred_element_type=jnp.float32)
    o_ref[...] = (out + b2_ref[...]).astype(o_ref.dtype)


def prepare_params(w1, b1, w2, b2, *, mm_dtype=jnp.bfloat16):
    """Pad + cast the static parameters ONCE (model-load time), not per forward.

    Weights are stored pre-transposed as [in_features, out_features]:
      w1: [In, H], b1: [H], w2: [H, Out], b2: [Out].
    Hidden/output feature dims are zero-padded to lane-dense multiples of 128;
    fc1's K dim stays at In so it matches the un-padded x block.  Padded hidden
    columns are relu(0 + 0) = 0 and hit zero rows of w2; padded output columns
    carry zero bias and are sliced off by the caller.
    """
    In, H = w1.shape
    H2, Out = w2.shape
    assert H == H2, "shape mismatch between w1 and w2"
    h_p = _round_up(H, _LANE)
    out_p = _round_up(Out, _LANE)
    w1_p = jnp.zeros((In, h_p), mm_dtype).at[:, :H].set(w1.astype(mm_dtype))
    b1_p = jnp.zeros((1, h_p), jnp.float32).at[0, :H].set(b1.astype(jnp.float32))
    w2_p = jnp.zeros((h_p, out_p), mm_dtype).at[:H, :Out].set(w2.astype(mm_dtype))
    b2_p = jnp.zeros((1, out_p), jnp.float32).at[0, :Out].set(b2.astype(jnp.float32))
    return {"w1": w1_p, "b1": b1_p, "w2": w2_p, "b2": b2_p, "dims": (In, H, Out)}


def neural_net_forward(x, params, *, max_tile_b=1024, out_dtype=None):
    """forward(x) = fc2(relu(fc1(x))).  x: [B, In] -> [B, Out]."""
    w1_p, b1_p, w2_p, b2_p = params["w1"], params["b1"], params["w2"], params["b2"]
    In, H, Out = params["dims"]
    B, in_x = x.shape
    assert in_x == In, "x feature dim does not match fc1"
    if out_dtype is None:
        out_dtype = x.dtype        # use jnp.bfloat16 here to halve output writeback
    h_p = w1_p.shape[1]
    out_p = w2_p.shape[1]

    # ---- batch tiling -------------------------------------------------------
    # (a) >= 2 tiles when the batch allows so the "parallel" axis can shard
    #     across both v7x TensorCores (no-op on single-TC v5e/v6e);
    # (b) re-clamp tile_b to ~B/num_tiles (sublane-rounded) so the last tile
    #     doesn't pad nearly a full extra tile of wasted DMA/compute.
    tile_b = max(_SUBLANE, _round_up(min(max_tile_b, B), _SUBLANE))
    if B >= 2 * _SUBLANE:
        tile_b = min(tile_b, _round_up(_cdiv(B, 2), _SUBLANE))
    num_tiles = _cdiv(B, tile_b)
    tile_b = _round_up(_cdiv(B, num_tiles), _SUBLANE)
    b_p = num_tiles * tile_b

    # Pad only the batch dim, and only when needed (feature dim stays at In,
    # dtype stays as-is: the bf16 cast happens inside the kernel).
    x_in = x if b_p == B else jnp.zeros((b_p, In), x.dtype).at[:B].set(x)

    # ---- scheduling hints ---------------------------------------------------
    flops = 2 * b_p * (In * h_p + h_p * out_p)
    bytes_accessed = (
        b_p * In * x.dtype.itemsize
        + w1_p.size * w1_p.dtype.itemsize
        + w2_p.size * w2_p.dtype.itemsize
        + (b1_p.size + b2_p.size) * 4
        + b_p * out_p * jnp.dtype(out_dtype).itemsize
    )
    # Explicit scoped-VMEM budget from actual tile/weight sizes (double-buffered)
    # with headroom, clamped to v7x's 64 MiB physical VMEM.
    dbl_buffered = 2 * (
        tile_b * In * x.dtype.itemsize
        + tile_b * out_p * jnp.dtype(out_dtype).itemsize
        + w1_p.size * w1_p.dtype.itemsize + b1_p.size * 4
        + w2_p.size * w2_p.dtype.itemsize + b2_p.size * 4
    )
    vmem_limit = int(min(64 << 20, max(2 * dbl_buffered + (4 << 20), 16 << 20)))

    out_padded = pl.pallas_call(
        _mlp_kernel,
        out_shape=jax.ShapeDtypeStruct((b_p, out_p), out_dtype),
        grid=(num_tiles,),
        in_specs=[
            # x: batch-tiled, software-pipelined; last dim == full array dim.
            pl.BlockSpec((tile_b, In), lambda i: (i, 0)),
            # Weights/biases: whole-array blocks with constant index_map ->
            # VMEM-resident across the batch grid.  At large H/Out, add
            # pipeline_mode=pl.Buffered(1) here to single-buffer them on v7x.
            pl.BlockSpec((In, h_p), lambda i: (0, 0)),
            pl.BlockSpec((1, h_p), lambda i: (0, 0)),
            pl.BlockSpec((h_p, out_p), lambda i: (0, 0)),
            pl.BlockSpec((1, out_p), lambda i: (0, 0)),
        ],
        out_specs=pl.BlockSpec((tile_b, out_p), lambda i: (i, 0)),
        compiler_params=pltpu.CompilerParams(
            dimension_semantics=("parallel",),   # shards batch tiles over v7x's 2 TCs
            vmem_limit_bytes=vmem_limit,
        ),
        cost_estimate=pl.CostEstimate(
            flops=flops, transcendentals=0, bytes_accessed=bytes_accessed),
    )(x_in, w1_p, b1_p, w2_p, b2_p)

    # Drop batch/feature padding (stays lazy/fused under jit).
    return out_padded[:B, :Out]


def init_params(key, input_size, hidden_size, output_size, dtype=jnp.float32):
    """Deterministic init mimicking nn.Linear default (uniform +/- 1/sqrt(fan_in))."""
    k1, k2, k3, k4 = jax.random.split(key, 4)
    bound1 = 1.0 / (input_size ** 0.5)
    bound2 = 1.0 / (hidden_size ** 0.5)
    # Stored pre-transposed: [in, out]
    w1 = jax.random.uniform(k1, (input_size, hidden_size), dtype, -bound1, bound1)
    b1 = jax.random.uniform(k2, (hidden_size,), dtype, -bound1, bound1)
    w2 = jax.random.uniform(k3, (hidden_size, output_size), dtype, -bound2, bound2)
    b2 = jax.random.uniform(k4, (output_size,), dtype, -bound2, bound2)
    return w1, b1, w2, b2


if __name__ == "__main__":
    input_size, hidden_size, output_size = 32, 64, 16
    batch = 8

    key = jax.random.PRNGKey(0)
    kx, kp = jax.random.split(key)
    x = jax.random.normal(kx, (batch, input_size), jnp.float32)
    w1, b1, w2, b2 = init_params(kp, input_size, hidden_size, output_size)

    # Static parameter prep happens exactly once (model-load time).
    prepared = prepare_params(w1, b1, w2, b2)

    out = neural_net_forward(x, prepared)
    out = jax.block_until_ready(out)

    # Pure-JAX reference with the same bf16-operand / f32-accumulate matmuls.
    h_ref = jnp.dot(x.astype(jnp.bfloat16), w1.astype(jnp.bfloat16),
                    preferred_element_type=jnp.float32) + b1
    h_ref = jnp.maximum(h_ref, 0.0)
    ref = jnp.dot(h_ref.astype(jnp.bfloat16), w2.astype(jnp.bfloat16),
                  preferred_element_type=jnp.float32) + b2

    assert out.shape == (batch, output_size)
    assert jnp.allclose(out, ref, atol=2e-2, rtol=2e-2), \
        float(jnp.max(jnp.abs(out - ref)))

    print("KERNEL_OK")
</pallas_src>

<mosaic_0001>
module attributes {stable_mosaic.version = 11 : i64} {
  func.func @_mlp_kernel(%arg0: i32, %arg1: memref<8x32xf32, #tpu.memory_space<vmem>>, %arg2: memref<32x128xbf16, #tpu.memory_space<vmem>>, %arg3: memref<1x128xf32, #tpu.memory_space<vmem>>, %arg4: memref<128x128xbf16, #tpu.memory_space<vmem>>, %arg5: memref<1x128xf32, #tpu.memory_space<vmem>>, %arg6: memref<8x128xf32, #tpu.memory_space<vmem>>) attributes {dimension_semantics = [#tpu.dimension_semantics<parallel>], iteration_bounds = array<i64: 1>, scalar_prefetch = 0 : i64, scratch_operands = 0 : i64, tpu.core_type = #tpu.core_type<tc>, window_params = [{transform_indices = @transform_0, window_bounds = array<i64: 8, 32>}, {pipeline_mode = #tpu.pipeline_mode<synchronous>, transform_indices = @transform_1, window_bounds = array<i64: 32, 128>}, {pipeline_mode = #tpu.pipeline_mode<synchronous>, transform_indices = @transform_2, window_bounds = array<i64: 1, 128>}, {pipeline_mode = #tpu.pipeline_mode<synchronous>, transform_indices = @transform_3, window_bounds = array<i64: 128, 128>}, {pipeline_mode = #tpu.pipeline_mode<synchronous>, transform_indices = @transform_4, window_bounds = array<i64: 1, 128>}, {transform_indices = @transform_5, window_bounds = array<i64: 8, 128>}]} {
    %c0 = arith.constant 0 : index
    %c0_0 = arith.constant 0 : index
    %0 = vector.load %arg1[%c0, %c0_0] : memref<8x32xf32, #tpu.memory_space<vmem>>, vector<8x32xf32>
    %1 = arith.truncf %0 : vector<8x32xf32> to vector<8x32xbf16>
    %c0_1 = arith.constant 0 : index
    %c0_2 = arith.constant 0 : index
    %2 = vector.load %arg2[%c0_1, %c0_2] : memref<32x128xbf16, #tpu.memory_space<vmem>>, vector<32x128xbf16>
    %cst = arith.constant dense<0.000000e+00> : vector<8x128xf32>
    %3 = tpu.matmul %1, %2, %cst {dimension_numbers = #tpu.dot_dimension_numbers<[1], [0], [0], [1], [0, 0, 1, 1], [], []>} : vector<8x32xbf16>, vector<32x128xbf16>, vector<8x128xf32> -> vector<8x128xf32>
    %c0_3 = arith.constant 0 : index
    %c0_4 = arith.constant 0 : index
    %4 = vector.load %arg3[%c0_3, %c0_4] : memref<1x128xf32, #tpu.memory_space<vmem>>, vector<1x128xf32>
    %5 = vector.broadcast %4 : vector<1x128xf32> to vector<8x128xf32>
    %6 = arith.addf %3, %5 : vector<8x128xf32>
    %cst_5 = arith.constant 0.000000e+00 : f32
    %7 = vector.broadcast %cst_5 : f32 to vector<8x128xf32>
    %8 = arith.maximumf %6, %7 : vector<8x128xf32>
    %9 = arith.truncf %8 : vector<8x128xf32> to vector<8x128xbf16>
    %c0_6 = arith.constant 0 : index
    %c0_7 = arith.constant 0 : index
    %10 = vector.load %arg4[%c0_6, %c0_7] : memref<128x128xbf16, #tpu.memory_space<vmem>>, vector<128x128xbf16>
    %cst_8 = arith.constant dense<0.000000e+00> : vector<8x128xf32>
    %11 = tpu.matmul %9, %10, %cst_8 {dimension_numbers = #tpu.dot_dimension_numbers<[1], [0], [0], [1], [0, 0, 1, 1], [], []>} : vector<8x128xbf16>, vector<128x128xbf16>, vector<8x128xf32> -> vector<8x128xf32>
    %c0_9 = arith.constant 0 : index
    %c0_10 = arith.constant 0 : index
    %12 = vector.load %arg5[%c0_9, %c0_10] : memref<1x128xf32, #tpu.memory_space<vmem>>, vector<1x128xf32>
    %13 = vector.broadcast %12 : vector<1x128xf32> to vector<8x128xf32>
    %14 = arith.addf %11, %13 : vector<8x128xf32>
    %c0_11 = arith.constant 0 : index
    %c0_12 = arith.constant 0 : index
    %15 = vector.load %arg6[%c0_11, %c0_12] : memref<8x128xf32, #tpu.memory_space<vmem>>, vector<8x128xf32>
    tpu.vector_store %arg6[%c0_11, %c0_12], %14 {strides = array<i32>} : memref<8x128xf32, #tpu.memory_space<vmem>>, vector<8x128xf32>,
    return
  }
  func.func @transform_0(%arg0: i32) -> (i32, i32) {
    %c0_i32 = arith.constant 0 : i32
    %c0_i32_0 = arith.constant 0 : i32
    return %arg0, %c0_i32 : i32, i32
  }
  func.func @transform_1(%arg0: i32) -> (i32, i32) {
    %c0_i32 = arith.constant 0 : i32
    %c0_i32_0 = arith.constant 0 : i32
    %c0_i32_1 = arith.constant 0 : i32
    return %c0_i32, %c0_i32_0 : i32, i32
  }
  func.func @transform_2(%arg0: i32) -> (i32, i32) {
    %c0_i32 = arith.constant 0 : i32
    %c0_i32_0 = arith.constant 0 : i32
    %c0_i32_1 = arith.constant 0 : i32
    return %c0_i32, %c0_i32_0 : i32, i32
  }
  func.func @transform_3(%arg0: i32) -> (i32, i32) {
    %c0_i32 = arith.constant 0 : i32
    %c0_i32_0 = arith.constant 0 : i32
    %c0_i32_1 = arith.constant 0 : i32
    return %c0_i32, %c0_i32_0 : i32, i32
  }
  func.func @transform_4(%arg0: i32) -> (i32, i32) {
    %c0_i32 = arith.constant 0 : i32
    %c0_i32_0 = arith.constant 0 : i32
    %c0_i32_1 = arith.constant 0 : i32
    return %c0_i32, %c0_i32_0 : i32, i32
  }
  func.func @transform_5(%arg0: i32) -> (i32, i32) {
    %c0_i32 = arith.constant 0 : i32
    %c0_i32_0 = arith.constant 0 : i32
    return %arg0, %c0_i32 : i32, i32
  }
}

</mosaic_0001>

<bundles_post_ra>
// kernel: tpu_custom_call.1
= control target key start
LH: loop header
LB: loop body
LE: loop exit
PB: predicated region body
PF: predicated region fallthrough
CT: control target
= control target key end

     0   :  { %10 = vsyncpa [#allocation3], 0  ;;  %s423_s0 = inlined_call_operand.hbm [shape: f32[8,32], index: 0, kind: input, shape index: {}]   ;;  %s424_s1 = inlined_call_operand.hbm [shape: bf16[32,128], index: 1, kind: input, shape index: {}]   ;;  %s425_s2 = inlined_call_operand.vmem [shape: f32[1,128], index: 2, kind: input, shape index: {}]   ;;  %s426_s3 = inlined_call_operand.hbm [shape: bf16[128,128], index: 3, kind: input, shape index: {}]   ;;  %s427_s4 = inlined_call_operand.vmem [shape: f32[1,128], index: 4, kind: input, shape index: {}]   ;;  %s428_s5 = inlined_call_operand.hbm [shape: f32[8,128], index: 5, kind: output, shape index: {}]  }
   0x1   :  { %11 = vsyncpa [#allocation6], 0  ;;  %s28_s20 = sshll.u32 %s424_s1, 4  ;;  %s29_s20 = int_to_ptr.hbm [resolvable:$true] %s28_s20 }
   0x2   :  { %12 = vsyncpa [#allocation4], 0  ;;  %s369_s21 = smov [#allocation5]   ;;  %s18_s25 = sshll.u32 %s423_s0, 4  ;;  %s19_s25 = int_to_ptr.hbm [resolvable:$true] %s18_s25 }
   0x3   :  { %s30_s22 = sshll.u32 %s369_s21, 4  ;;  %s370_s26 = smov 64   ;;  %s31_s22 = int_to_ptr.vmem [resolvable:$true] %s30_s22 }
   0x4   :  { %s371_s27 = smov 4   ;;  %s372_s28 = smov [#allocation2]  }
   0x5   :  { %36 = dma.hbm_to_vmem [thread:$0]  %s29_s20, 256, %s31_s22, [#allocation6], %s370_s26, %s370_s26, %s371_s27  }
   0x6   :  { %s20_s29 = sshll.u32 %s372_s28, 4  ;;  %s43_s7 = sshll.u32 %s426_s3, 4  ;;  %s21_s29 = int_to_ptr.vmem [resolvable:$true] %s20_s29  ;;  %s44_s7 = int_to_ptr.hbm [resolvable:$true] %s43_s7 }
   0x7   :  { %23 = dma.hbm_to_vmem [thread:$0]  %s19_s25, 128, %s21_s29, [#allocation3]  }
   0x8   :  { %s373_s1 = smov [#allocation7]  }
   0x9   :  { %s45_s8 = sshll.u32 %s373_s1, 4  ;;  %s46_s8 = int_to_ptr.vmem [resolvable:$true] %s45_s8 }
   0xa   :  { %51 = dma.hbm_to_vmem [thread:$0]  %s44_s7, 1024, %s46_s8, [#allocation6], %s370_s26, %s370_s26, %s371_s27  }
   0xb   :  { %363 = dma.done.wait [#allocation3], 128  }
   0xc   :  { %364 = vsyncadd [#allocation3], 4294967168 }
   0xd   :  { %365 = dma.done.wait [#allocation6], 1280  }
   0xe   :  { %366 = vsyncadd [#allocation6], 4294966016  ;;  %v250_v0 = vld [vmem:[#allocation5 + $0x8] sm:$0xff]  ;;  %v249_v2 = vld [vmem:[#allocation5] sm:$0xff]  ;;  %vm89_vm0 = vcmask 261120   ;;  %s374_s11 = smov [#allocation8]  }
   0xf   :  { %v258_v1 = vld [vmem:[#allocation7 + $0x38] sm:$0xff]  ;;  %99 = vmatpush.bf16.msra.mxu0 %v250_v0  ;;  %v67_v3 = vld [vmem:[#allocation2] sm:$0xff]  ;;  %v257_v4 = vld [vmem:[#allocation7 + $0x30] sm:$0xff]  ;;  %s195_s12 = sshll.u32 %s374_s11, 4  ;;  %s197_s15 = sshll.u32 %s428_s5, 4  ;;  %s196_s12 = int_to_ptr.vmem [resolvable:$true] %s195_s12  ;;  %s198_s15 = int_to_ptr.hbm [resolvable:$true] %s197_s15 }
  0x10   :  { %176 = vmatpush.bf16.msra.mxu1 %v258_v1  ;;  %v68_v5 = vpack.c.bf16 %v67_v3, %v67_v3  ;;  %v256_v6 = vld [vmem:[#allocation7 + $0x28] sm:$0xff]  ;;  %v255_v7 = vld [vmem:[#allocation7 + $0x20] sm:$0xff]  ;;  %v254_v8 = vld [vmem:[#allocation7 + $0x18] sm:$0xff] }
  0x11   :  { %v253_v9 = vld [vmem:[#allocation7 + $0x10] sm:$0xff]  ;;  %v252_v10 = vld [vmem:[#allocation7 + $0x8] sm:$0xff]  ;;  %v251_v11 = vld [vmem:[#allocation7] sm:$0xff] }
  0x12   :  { %v265_v12 = vld [vmem:[%s425_s2] ss:$0 sm:$0xff] }
  0x13   :  { %100 = vmatpush.bf16.msra.mxu0 %v249_v2  ;;  %v266_v18 = vld [vmem:[%s427_s4] ss:$0 sm:$0xff] }
  0x14   :  { %177 = vmatpush.bf16.msra.mxu1 %v257_v4 }
  0x16   :  { %216 = vmatmul.msk.bf16.vlgmr.msra.gmra.mxu0 %vm89_vm0, %v68_v5 }
  0x18   :  { %178 = vmatpush.bf16.msra.mxu1 %v256_v6 }
  0x1c   :  { %179 = vmatpush.bf16.msra.mxu1 %v255_v7 }
  0x20   :  { %180 = vmatpush.bf16.msra.mxu1 %v254_v8 }
  0x24   :  { %181 = vmatpush.bf16.msra.mxu1 %v253_v9 }
  0x28   :  { %182 = vmatpush.bf16.msra.mxu1 %v252_v10 }
  0x2c   :  { %183 = vmatpush.bf16.msra.mxu1 %v251_v11 }
  0x93   :  { %v102_v13 = vpop.f32.mrf.mxu0 }
  0x94   :  { %v103_v14 = vadd.f32 %v265_v12, %v102_v13 }
  0x96   :  { %v106_v15 = vmax.f32 %v103_v14, 0.0 }
  0x98   :  { %v107_v16 = vpack.c.bf16 %v106_v15, %v106_v15 }
  0x9a   :  { %184 = vmatmul.bf16.vlgmr.msra.gmra.mxu1 %v107_v16 }
  0x9b   :  { %v104_v17 = vpop.f32.mrf.mxu0 }
 0x117   :  { %v185_v19 = vpop.f32.mrf.mxu1 }
 0x118   :  { %v186_v20 = vadd.f32 %v266_v18, %v185_v19 }
 0x11a   :  { %189 = vst [vmem:[#allocation8] sm:$0xff] %v186_v20 }
 0x11b   :  { %200 = dma.vmem_to_hbm [thread:$0]  %s196_s12, 128, %s198_s15, [#allocation4]  }
 0x11f   :  { %v187_v21 = vpop.f32.mrf.mxu1 }
 0x120   :  { %367 = dma.done.wait [#allocation4], 128  }
 0x121   :  { %368 = vsyncadd [#allocation4], 4294967168 }
 0x122   :  { %205 = vsyncpa [#allocation3], 1 }
 0x123   :  { %206 = vsyncpa [#allocation6], 1 }
 0x124   :  { %207 = vsyncpa [#allocation4], 1 }

</bundles_post_ra>
